<compile_context>
chip_gen: v6e
topology: v6e:2x2x1
jax: 0.10.0
libtpu: 0.0.40
codegen_flags: <defaults>
</compile_context>

<pallas_src>
import functools

import jax
import jax.numpy as jnp
from jax import lax
from jax.experimental import pallas as pl
from jax.experimental.pallas import tpu as pltpu

EPS = 1e-5


def _round_up(x, m):
    return (x + m - 1) // m * m


def _ln_mm_kernel(x_ref, w_ref, gamma_ref, beta_ref, b_ref, o_ref, xln_ref, *, inv_n):
    # x_ref:     (tm, N)   full N resident (needed for LN stats)
    # w_ref:     (N, tn)
    # gamma_ref: (1, N)
    # beta_ref:  (1, N)
    # b_ref:     (1, tn)
    # o_ref:     (tm, tn)
    # xln_ref:   (tm, N)   persistent VMEM scratch, weight dtype
    @pl.when(pl.program_id(1) == 0)
    def _():
        x = x_ref[...].astype(jnp.float32)
        # Two-pass (centered) variance: robust against catastrophic
        # cancellation for non-centered f32 inputs.
        mean = jnp.sum(x, axis=-1, keepdims=True) * inv_n
        xc = x - mean
        var = jnp.sum(xc * xc, axis=-1, keepdims=True) * inv_n
        rstd = lax.rsqrt(var + EPS)
        gamma = gamma_ref[...].astype(jnp.float32)   # (1, N) broadcasts over rows
        beta = beta_ref[...].astype(jnp.float32)
        # No separate full-tile `scale` temporary; cast to weight dtype once so
        # bf16 weights use the bf16 MXU path on all subsequent j iterations.
        xln_ref[...] = ((xc * rstd) * gamma + beta).astype(xln_ref.dtype)

    out = jnp.dot(xln_ref[...], w_ref[...], preferred_element_type=jnp.float32)
    out = out + b_ref[...].astype(jnp.float32)
    o_ref[...] = out.astype(o_ref.dtype)


def _vmem_budget_bytes():
    """~75% of physical per-core VMEM (48 MiB on v7x, 96 MiB on v5e/v6e)."""
    try:
        phys = pltpu.get_tpu_info().vmem_capacity_bytes
    except Exception:
        phys = 64 * 1024 * 1024
    return int(phys * 0.75)


def _vmem_estimate(tm, tn, N, x_bytes, w_bytes, out_bytes):
    x_tiles = 2 * tm * N * x_bytes            # double-buffered x tile
    w_tiles = 2 * N * tn * w_bytes            # double-buffered w tile
    o_tiles = 2 * tm * tn * out_bytes         # double-buffered out tile
    small = 2 * (2 * N + tn) * 4              # gamma, beta, bias
    scratch = tm * N * w_bytes                # cached LN result
    temps = 2 * tm * N * 4                    # in-kernel f32 full-tile temporaries
    return x_tiles + w_tiles + o_tiles + small + scratch + temps


def _pick_tn(D, tile_cols):
    """Largest divisor of D that is a multiple of 128 and <= tile_cols."""
    best = None
    for cand in range(128, min(D, tile_cols) + 1, 128):
        if D % cand == 0:
            best = cand
    return best if best is not None else D


def ln_matmul(x, w, b, gamma, beta, *, tile_rows=256, tile_cols=512):
    """Fused LayerNorm(x) @ w + b, matching lnMatmulBlock.forward."""
    orig_shape = x.shape
    N, D = w.shape
    assert x.shape[-1] == N
    assert gamma.shape == (N,)
    assert beta.shape == (N,)
    assert b.shape == (D,)

    x2 = x.reshape(-1, N)
    rows = x2.shape[0]

    x_bytes = jnp.dtype(x.dtype).itemsize
    w_bytes = jnp.dtype(w.dtype).itemsize
    out_bytes = x_bytes

    # Sublane alignment by dtype: f32 -> 8 rows, bf16 -> 16, int8/fp8 -> 32.
    row_align = max(8, 32 // max(x_bytes, 1))

    # Output-axis tile: lane-dense divisor of D when possible.  When D itself
    # is the tile (small/medium D), w has a constant block index and stays
    # resident across all row tiles (single HBM fetch).
    tn = _pick_tn(D, tile_cols)

    budget = _vmem_budget_bytes()

    # Row tile: as large as requested, but (a) never bigger than the aligned
    # row count, (b) shrunk when zero-padding waste would exceed ~25%, and
    # (c) shrunk until the tiles + scratch + temporaries fit the VMEM budget.
    tm = min(tile_rows, _round_up(rows, row_align))
    tm = max(row_align, _round_up(tm, row_align))
    while tm > row_align:
        rows_p = _round_up(rows, tm)
        waste_ok = (rows_p - rows) * 4 <= rows_p
        fits = _vmem_estimate(tm, tn, N, x_bytes, w_bytes, out_bytes) <= budget
        if waste_ok and fits:
            break
        tm = max(row_align, _round_up(tm // 2, row_align))
    rows_p = _round_up(rows, tm)
    if rows_p != rows:
        x2 = jnp.pad(x2, ((0, rows_p - rows), (0, 0)))

    est = _vmem_estimate(tm, tn, N, x_bytes, w_bytes, out_bytes)
    vmem_limit = int(max(budget, est + (est // 4)))

    gamma2 = gamma.reshape(1, N)
    beta2 = beta.reshape(1, N)
    b2 = b.reshape(1, D)

    grid = (rows_p // tm, D // tn)

    kernel = functools.partial(_ln_mm_kernel, inv_n=1.0 / N)

    out2 = pl.pallas_call(
        kernel,
        out_shape=jax.ShapeDtypeStruct((rows_p, D), x.dtype),
        grid_spec=pltpu.PrefetchScalarGridSpec(
            num_scalar_prefetch=0,
            grid=grid,
            in_specs=[
                pl.BlockSpec((tm, N), lambda i, j: (i, 0)),      # x (constant along j)
                pl.BlockSpec((N, tn), lambda i, j: (0, j)),      # w
                pl.BlockSpec((1, N), lambda i, j: (0, 0)),       # gamma
                pl.BlockSpec((1, N), lambda i, j: (0, 0)),       # beta
                pl.BlockSpec((1, tn), lambda i, j: (0, j)),      # b
            ],
            out_specs=pl.BlockSpec((tm, tn), lambda i, j: (i, j)),
            scratch_shapes=[pltpu.VMEM((tm, N), w.dtype)],       # cached LN result
        ),
        compiler_params=pltpu.CompilerParams(
            # Row axis shards cleanly across TensorCores; the column axis must
            # be "arbitrary" so the cached-LN scratch legally persists across j.
            dimension_semantics=("parallel", "arbitrary"),
            vmem_limit_bytes=vmem_limit,
        ),
    )(x2, w, gamma2, beta2, b2)

    if rows_p != rows:
        out2 = out2[:rows]
    return out2.reshape(*orig_shape[:-1], D)


def ln_matmul_ref(x, w, b, gamma, beta):
    xf = x.astype(jnp.float32)
    mean = jnp.mean(xf, axis=-1, keepdims=True)
    var = jnp.mean((xf - mean) ** 2, axis=-1, keepdims=True)
    rstd = lax.rsqrt(var + EPS)
    x_ln = (xf - mean) * rstd * gamma.astype(jnp.float32) + beta.astype(jnp.float32)
    out = x_ln @ w.astype(jnp.float32) + b.astype(jnp.float32)
    return out.astype(x.dtype)


if __name__ == "__main__":
    key = jax.random.PRNGKey(0)
    kx, kw = jax.random.split(key)

    # Small shapes consistent with the module: x is (B, M, N), w is (N, D).
    B, M, N, D = 2, 8, 32, 64

    x = jax.random.normal(kx, (B, M, N), dtype=jnp.float32)

    # Deterministic parameter init mirroring lnMatmulBlock.__init__:
    #   w ~ Normal(0, 0.02), b = 0, gamma = 1, beta = 0.
    w = 0.02 * jax.random.normal(kw, (N, D), dtype=jnp.float32)
    b = jnp.zeros((D,), dtype=jnp.float32)
    gamma = jnp.ones((N,), dtype=jnp.float32)
    beta = jnp.zeros((N,), dtype=jnp.float32)

    out = ln_matmul(x, w, b, gamma, beta)
    out = jax.block_until_ready(out)

    ref = ln_matmul_ref(x, w, b, gamma, beta)
    assert out.shape == (B, M, D)
    assert jnp.allclose(out, ref, atol=1e-4, rtol=1e-4)

    print("KERNEL_OK")
</pallas_src>

<mosaic_0001>
module attributes {stable_mosaic.version = 11 : i64} {
  func.func @_ln_mm_kernel(%arg0: i32, %arg1: i32, %arg2: memref<16x32xf32, #tpu.memory_space<vmem>>, %arg3: memref<32x64xf32, #tpu.memory_space<vmem>>, %arg4: memref<1x32xf32, #tpu.memory_space<vmem>>, %arg5: memref<1x32xf32, #tpu.memory_space<vmem>>, %arg6: memref<1x64xf32, #tpu.memory_space<vmem>>, %arg7: memref<16x64xf32, #tpu.memory_space<vmem>>, %arg8: memref<16x32xf32, #tpu.memory_space<vmem>>) attributes {dimension_semantics = [#tpu.dimension_semantics<parallel>, #tpu.dimension_semantics<arbitrary>], iteration_bounds = array<i64: 1, 1>, scalar_prefetch = 0 : i64, scratch_operands = 1 : i64, tpu.core_type = #tpu.core_type<tc>, window_params = [{transform_indices = @transform_0, window_bounds = array<i64: 16, 32>}, {transform_indices = @transform_1, window_bounds = array<i64: 32, 64>}, {pipeline_mode = #tpu.pipeline_mode<synchronous>, transform_indices = @transform_2, window_bounds = array<i64: 1, 32>}, {pipeline_mode = #tpu.pipeline_mode<synchronous>, transform_indices = @transform_3, window_bounds = array<i64: 1, 32>}, {transform_indices = @transform_4, window_bounds = array<i64: 1, 64>}, {transform_indices = @transform_5, window_bounds = array<i64: 16, 64>}]} {
    %c0_i32 = arith.constant 0 : i32
    %0 = arith.cmpi eq, %arg1, %c0_i32 : i32
    %1 = arith.extui %0 : i1 to i32
    %c0_i32_0 = arith.constant 0 : i32
    %2 = arith.cmpi ne, %1, %c0_i32_0 : i32
    scf.if %2 {
      %c0_8 = arith.constant 0 : index
      %c0_9 = arith.constant 0 : index
      %10 = vector.load %arg2[%c0_8, %c0_9] : memref<16x32xf32, #tpu.memory_space<vmem>>, vector<16x32xf32>
      %cst_10 = arith.constant dense<0.000000e+00> : vector<16xf32>
      %11 = vector.multi_reduction <add>, %10, %cst_10 [1] : vector<16x32xf32> to vector<16xf32>
      %12 = vector.shape_cast %11 : vector<16xf32> to vector<16x1xf32>
      %cst_11 = arith.constant 3.125000e-02 : f32
      %13 = vector.broadcast %cst_11 : f32 to vector<16x1xf32>
      %14 = arith.mulf %12, %13 : vector<16x1xf32>
      %15 = vector.broadcast %14 : vector<16x1xf32> to vector<16x32xf32>
      %16 = arith.subf %10, %15 : vector<16x32xf32>
      %17 = arith.mulf %16, %16 : vector<16x32xf32>
      %cst_12 = arith.constant dense<0.000000e+00> : vector<16xf32>
      %18 = vector.multi_reduction <add>, %17, %cst_12 [1] : vector<16x32xf32> to vector<16xf32>
      %19 = vector.shape_cast %18 : vector<16xf32> to vector<16x1xf32>
      %cst_13 = arith.constant 3.125000e-02 : f32
      %20 = vector.broadcast %cst_13 : f32 to vector<16x1xf32>
      %21 = arith.mulf %19, %20 : vector<16x1xf32>
      %cst_14 = arith.constant 9.99999974E-6 : f32
      %22 = vector.broadcast %cst_14 : f32 to vector<16x1xf32>
      %23 = arith.addf %21, %22 : vector<16x1xf32>
      %24 = math.rsqrt %23 : vector<16x1xf32>
      %c0_15 = arith.constant 0 : index
      %c0_16 = arith.constant 0 : index
      %25 = vector.load %arg4[%c0_15, %c0_16] : memref<1x32xf32, #tpu.memory_space<vmem>>, vector<1x32xf32>
      %c0_17 = arith.constant 0 : index
      %c0_18 = arith.constant 0 : index
      %26 = vector.load %arg5[%c0_17, %c0_18] : memref<1x32xf32, #tpu.memory_space<vmem>>, vector<1x32xf32>
      %27 = vector.broadcast %24 : vector<16x1xf32> to vector<16x32xf32>
      %28 = arith.mulf %16, %27 : vector<16x32xf32>
      %29 = vector.broadcast %25 : vector<1x32xf32> to vector<16x32xf32>
      %30 = arith.mulf %28, %29 : vector<16x32xf32>
      %31 = vector.broadcast %26 : vector<1x32xf32> to vector<16x32xf32>
      %32 = arith.addf %30, %31 : vector<16x32xf32>
      %c0_19 = arith.constant 0 : index
      %c0_20 = arith.constant 0 : index
      %33 = vector.load %arg8[%c0_19, %c0_20] : memref<16x32xf32, #tpu.memory_space<vmem>>, vector<16x32xf32>
      tpu.vector_store %arg8[%c0_19, %c0_20], %32 {strides = array<i32>} : memref<16x32xf32, #tpu.memory_space<vmem>>, vector<16x32xf32>,
    } else {
    }
    %c0 = arith.constant 0 : index
    %c0_1 = arith.constant 0 : index
    %3 = vector.load %arg8[%c0, %c0_1] : memref<16x32xf32, #tpu.memory_space<vmem>>, vector<16x32xf32>
    %c0_2 = arith.constant 0 : index
    %c0_3 = arith.constant 0 : index
    %4 = vector.load %arg3[%c0_2, %c0_3] : memref<32x64xf32, #tpu.memory_space<vmem>>, vector<32x64xf32>
    %cst = arith.constant dense<0.000000e+00> : vector<16x64xf32>
    %5 = tpu.matmul %3, %4, %cst {dimension_numbers = #tpu.dot_dimension_numbers<[1], [0], [0], [1], [0, 0, 1, 1], [], []>} : vector<16x32xf32>, vector<32x64xf32>, vector<16x64xf32> -> vector<16x64xf32>
    %c0_4 = arith.constant 0 : index
    %c0_5 = arith.constant 0 : index
    %6 = vector.load %arg6[%c0_4, %c0_5] : memref<1x64xf32, #tpu.memory_space<vmem>>, vector<1x64xf32>
    %7 = vector.broadcast %6 : vector<1x64xf32> to vector<16x64xf32>
    %8 = arith.addf %5, %7 : vector<16x64xf32>
    %c0_6 = arith.constant 0 : index
    %c0_7 = arith.constant 0 : index
    %9 = vector.load %arg7[%c0_6, %c0_7] : memref<16x64xf32, #tpu.memory_space<vmem>>, vector<16x64xf32>
    tpu.vector_store %arg7[%c0_6, %c0_7], %8 {strides = array<i32>} : memref<16x64xf32, #tpu.memory_space<vmem>>, vector<16x64xf32>,
    return
  }
  func.func @transform_0(%arg0: i32, %arg1: i32) -> (i32, i32) {
    %c0_i32 = arith.constant 0 : i32
    %c0_i32_0 = arith.constant 0 : i32
    return %arg0, %c0_i32 : i32, i32
  }
  func.func @transform_1(%arg0: i32, %arg1: i32) -> (i32, i32) {
    %c0_i32 = arith.constant 0 : i32
    %c0_i32_0 = arith.constant 0 : i32
    return %c0_i32, %arg1 : i32, i32
  }
  func.func @transform_2(%arg0: i32, %arg1: i32) -> (i32, i32) {
    %c0_i32 = arith.constant 0 : i32
    %c0_i32_0 = arith.constant 0 : i32
    %c0_i32_1 = arith.constant 0 : i32
    return %c0_i32, %c0_i32_0 : i32, i32
  }
  func.func @transform_3(%arg0: i32, %arg1: i32) -> (i32, i32) {
    %c0_i32 = arith.constant 0 : i32
    %c0_i32_0 = arith.constant 0 : i32
    %c0_i32_1 = arith.constant 0 : i32
    return %c0_i32, %c0_i32_0 : i32, i32
  }
  func.func @transform_4(%arg0: i32, %arg1: i32) -> (i32, i32) {
    %c0_i32 = arith.constant 0 : i32
    %c0_i32_0 = arith.constant 0 : i32
    return %c0_i32, %arg1 : i32, i32
  }
  func.func @transform_5(%arg0: i32, %arg1: i32) -> (i32, i32) {
    %c0_i32 = arith.constant 0 : i32
    return %arg0, %arg1 : i32, i32
  }
}

</mosaic_0001>

<bundles_post_ra>
// kernel: tpu_custom_call.1
= control target key start
LH: loop header
LB: loop body
LE: loop exit
PB: predicated region body
PF: predicated region fallthrough
CT: control target
= control target key end

     0   :  { %10 = vsyncpa [#allocation4], 0  ;;  %s385_s0 = inlined_call_operand.hbm [shape: f32[16,32], index: 0, kind: input, shape index: {}]   ;;  %s386_s1 = inlined_call_operand.hbm [shape: f32[32,64], index: 1, kind: input, shape index: {}]   ;;  %s387_s2 = inlined_call_operand.vmem [shape: f32[1,32], index: 2, kind: input, shape index: {}]   ;;  %s388_s3 = inlined_call_operand.vmem [shape: f32[1,32], index: 3, kind: input, shape index: {}]   ;;  %s389_s4 = inlined_call_operand.vmem [shape: f32[1,64], index: 4, kind: input, shape index: {}]   ;;  %s390_s5 = inlined_call_operand.hbm [shape: f32[16,64], index: 5, kind: output, shape index: {}]  }
   0x1   :  { %11 = vsyncpa [#allocation7], 0 }
   0x2   :  { %12 = vsyncpa [#allocation5], 0  ;;  %s315_s18 = smov [#allocation3]  }
   0x3   :  { %s18_s19 = sshll.u32 %s315_s18, 4  ;;  %s19_s19 = int_to_ptr.vmem [resolvable:$true] %s18_s19 }
   0x4   :  { %s257_s20 = scalar_lea.vmem %s19_s19, 256  ;;  %p262_p1 = scmp.lt.s32.totalorder %s19_s19, %s19_s19 }
   0x5   :  { %p258_p0 = scmp.ne.s32.totalorder %s19_s19, %s257_s20  ;;  %p263_p2 = scmp.lt.s32.totalorder %s257_s20, %s257_s20 }
   0x7   :  { %p264_p3 = por %p263_p2, %p262_p1 }
   0x9   :  { %p265_p4 = pnand %p264_p3, %p258_p0 }
   0xb   :  { %268 = shalt.err (!%p265_p4)
}
   0xc   :  { %s316_s21 = smov 128   ;;  %s317_s22 = smov 8  }
   0xd   :  { %24 = dma.hbm_to_vmem [thread:$0]  %s385_s0, 256, %s19_s19, [#allocation4], %s316_s21, %s316_s21, %s317_s22  }
   0xe   :  { %s318_s25 = smov [#allocation6]  }
   0xf   :  { %s30_s26 = sshll.u32 %s318_s25, 4  ;;  %s31_s26 = int_to_ptr.vmem [resolvable:$true] %s30_s26 }
  0x10   :  { %s277_s27 = scalar_lea.vmem %s31_s26, 512  ;;  %p282_p6 = scmp.lt.s32.totalorder %s31_s26, %s31_s26 }
  0x11   :  { %p278_p5 = scmp.ne.s32.totalorder %s31_s26, %s277_s27  ;;  %p283_p7 = scmp.lt.s32.totalorder %s277_s27, %s277_s27 }
  0x13   :  { %p284_p8 = por %p283_p7, %p282_p6 }
  0x15   :  { %p285_p9 = pnand %p284_p8, %p278_p5 }
  0x17   :  { %288 = shalt.err (!%p285_p9)
}
  0x18   :  { %36 = dma.hbm_to_vmem [thread:$0]  %s386_s1, 512, %s31_s26, [#allocation7], %s316_s21, %s316_s21, %s317_s22  }
  0x19   :  { %309 = dma.done.wait [#allocation4], 256  }
  0x1a   :  { %310 = vsyncadd [#allocation4], 4294967040 }
  0x1b   :  { %311 = dma.done.wait [#allocation7], 512  }
  0x1c   :  { %312 = vsyncadd [#allocation7], 4294966784  ;;  %vm55_vm0 = vcmask 261120   ;;  %v53_v0 = vld [vmem:[#allocation3] sm:$0xff]  ;;  %v54_v1 = vld [vmem:[#allocation3 + $0x8] sm:$0xff]  ;;  %vm197_vm1 = vcmask 523264  }
  0x1d   :  { %v56_v2 = vsel %vm55_vm0, %v53_v0, 0.0  ;;  %v59_v3 = vsel %vm55_vm0, %v54_v1, 0.0  ;;  %v107_v14 = vld [vmem:[#allocation6 + $0x18] sm:$0xff]  ;;  %v106_v15 = vld [vmem:[#allocation6 + $0x10] sm:$0xff]  ;;  %v105_v16 = vld [vmem:[#allocation6 + $0x8] sm:$0xff] }
  0x1e   :  { %57 = vadd.xlane.f32.xlu0 %v56_v2  ;;  %229 = vmatprep.subr.mxu0 %v107_v14  ;;  %v104_v17 = vld [vmem:[#allocation6] sm:$0xff] }
  0x1f   :  { %230 = vmatpush3.msra.mxu0 %v107_v14  ;;  %v218_v25 = vld [vmem:[%s387_s2] ss:$0 sm:$0xff] }
  0x20   :  { %231 = vmatprep.subr.mxu0 %v106_v15  ;;  %v219_v27 = vld [vmem:[%s388_s3] ss:$0 sm:$0xff]  ;;  %s319_s3 = smov [#allocation8]  }
  0x21   :  { %232 = vmatpush3.msra.mxu0 %v106_v15  ;;  %v220_v36 = vld [vmem:[%s389_s4] ss:$0 sm:$0xff]  ;;  %s205_s8 = sshll.u32 %s319_s3, 4  ;;  %s206_s8 = int_to_ptr.vmem [resolvable:$true] %s205_s8 }
  0x22   :  { %60 = vadd.xlane.f32.xlu0 %v59_v3  ;;  %233 = vmatprep.subr.mxu0 %v105_v16  ;;  %s289_s9 = scalar_lea.vmem %s206_s8, 256  ;;  %p294_p11 = scmp.lt.s32.totalorder %s206_s8, %s206_s8 }
  0x23   :  { %234 = vmatpush3.msra.mxu0 %v105_v16  ;;  %p290_p10 = scmp.ne.s32.totalorder %s206_s8, %s289_s9  ;;  %p295_p12 = scmp.lt.s32.totalorder %s289_s9, %s289_s9 }
  0x24   :  { %235 = vmatprep.subr.mxu0 %v104_v17 }
  0x25   :  { %236 = vmatpush3.msra.mxu0 %v104_v17  ;;  %p296_p13 = por %p295_p12, %p294_p11 }
  0x27   :  { %p297_p0 = pnand %p296_p13, %p290_p10 }
  0xa7   :  { %v58_v4 = vpop.xlane.xlu0 %57 }
  0xa8   :  { %v62_v5 = vmul.f32 0.03125, %v58_v4 }
  0xaa   :  { %v64_v6 = vsub.f32 %v53_v0, %v62_v5 }
  0xab   :  { %v61_v7 = vpop.xlane.xlu0 %60 }
  0xac   :  { %v63_v8 = vmul.f32 0.03125, %v61_v7  ;;  %v66_v9 = vmul.f32 %v64_v6, %v64_v6 }
  0xae   :  { %v65_v10 = vsub.f32 %v54_v1, %v63_v8  ;;  %v68_v11 = vsel %vm55_vm0, %v66_v9, 0.0 }
  0xaf   :  { %69 = vadd.xlane.f32.xlu1 %v68_v11 }
  0xb0   :  { %v67_v12 = vmul.f32 %v65_v10, %v65_v10 }
  0xb2   :  { %v71_v13 = vsel %vm55_vm0, %v67_v12, 0.0 }
  0xb3   :  { %72 = vadd.xlane.f32.xlu1 %v71_v13 }
 0x138   :  { %v70_v18 = vpop.xlane.xlu1 %69 }
 0x139   :  { %v74_v19 = vmul.f32 0.03125, %v70_v18 }
 0x13b   :  { %v76_v20 = vadd.f32 1e-05, %v74_v19 }
 0x13c   :  { %v73_v21 = vpop.xlane.xlu1 %72 }
 0x13d   :  { %245 = vrsqrt.f32 %v76_v20  ;;  %v75_v22 = vmul.f32 0.03125, %v73_v21 }
 0x13f   :  { %v77_v23 = vadd.f32 1e-05, %v75_v22 }
 0x141   :  { %247 = vrsqrt.f32 %v77_v23 }
 0x14a   :  { %v246_v24 = vpop.eup %245 }
 0x14b   :  { %v82_v26 = vmul.f32 %v246_v24, %v64_v6 }
 0x14d   :  { %v90_v28 = vmul.f32 %v218_v25, %v82_v26 }
 0x14e   :  { %v248_v29 = vpop.eup %247 }
 0x14f   :  { %v98_v30 = vadd.f32 %v219_v27, %v90_v28  ;;  %v83_v31 = vmul.f32 %v248_v29, %v65_v10 }
 0x151   :  { %100 = vst.msk [vmem:[#allocation2] sm:$0xff] %vm55_vm0, %v98_v30  ;;  %v91_v32 = vmul.f32 %v218_v25, %v83_v31 }
 0x153   :  { %v99_v33 = vadd.f32 %v219_v27, %v91_v32 }
 0x155   :  { %101 = vst.msk [vmem:[#allocation2 + $0x8] sm:$0xff] %vm55_vm0, %v99_v33 }
 0x158   :  { %v102_v34 = vld [vmem:[#allocation2] sm:$0xff] }
 0x159   :  { %237 = vmatprep.mubr.msk.f32.mxu0 %vm55_vm0, %v102_v34 }
 0x15c   :  { %v103_v35 = vld [vmem:[#allocation2 + $0x8] sm:$0xff] }
 0x15d   :  { %238 = vmatmul.mubr.msk.f32.vlgmr.msra.gmra.mxu0 %vm55_vm0, %v103_v35 }
 0x21d   :  { %v239_v37 = vpop.f32.mrf.mxu0 }
 0x21e   :  { %v194_v38 = vadd.f32 %v239_v37, %v220_v36 }
 0x21f   :  { %v188_v39 = vpop.f32.mrf.mxu0 }
 0x220   :  { %v189_v40 = vadd.f32 %v220_v36, %v188_v39  ;;  %199 = vst.msk [vmem:[#allocation8 + $0x8] sm:$0xff] %vm197_vm1, %v194_v38 }
 0x222   :  { %198 = vst.msk [vmem:[#allocation8] sm:$0xff] %vm197_vm1, %v189_v40 }
 0x223   :  { %300 = shalt.err (!%p297_p0)
}
 0x224   :  { %211 = dma.vmem_to_hbm [thread:$0]  %s206_s8, 256, %s390_s5, [#allocation5], %s316_s21, %s316_s21, %s317_s22  }
 0x225   :  { %313 = dma.done.wait [#allocation5], 256  }
 0x226   :  { %314 = vsyncadd [#allocation5], 4294967040 }
 0x227   :  { %215 = vsyncpa [#allocation4], 1 }
 0x228   :  { %216 = vsyncpa [#allocation7], 1 }
 0x229   :  { %217 = vsyncpa [#allocation5], 1 }

</bundles_post_ra>
